<compile_context>
chip_gen: v7x
topology: tpu7x:2x2x1
jax: 0.10.0
libtpu: 0.0.40
codegen_flags: <defaults>
</compile_context>

<pallas_src>
import jax
import jax.numpy as jnp
from jax.experimental import pallas as pl
from jax.experimental.pallas import tpu as pltpu


# ----------------------------------------------------------------------------
# In-kernel helpers (traced; shapes are static).
# ----------------------------------------------------------------------------
def _bmm_f32(a, b):
    """Batched (Bt, M, K) @ (Bt, K, N) -> (Bt, M, N) with f32 MXU accumulation."""
    if a.shape[0] == 1:
        return jnp.dot(a[0], b[0], preferred_element_type=jnp.float32)[None]
    return jnp.einsum("bmk,bkn->bmn", a, b, preferred_element_type=jnp.float32)


def _row_tile(ref, tm):
    """Rows of a (Bt, N, F) ref that belong to the current adjacency row tile."""
    n = ref.shape[1]
    if tm == n:
        return ref[...]
    r0 = pl.multiple_of(pl.program_id(1) * tm, tm)
    return ref[:, pl.ds(r0, tm), :]


def _inv_degree(adj):
    """1 / (rowsum(adj) + 1), accumulated in f32 (adj may be bf16)."""
    deg = jnp.sum(adj, axis=-1, keepdims=True, dtype=jnp.float32) + 1.0
    return pl.reciprocal(deg, approx=True)                 # EUP slot, ~free


def _gcn_kernel_pre_hw(hw_ref, adj_ref, b_ref, o_ref):
    """F_out <= F_in path: hw = h @ W was precomputed by XLA in the wrapper.

    hw_ref:  (Bt, N, F_out)  bf16   full agent axis
    adj_ref: (Bt, tm, N)     bf16   adjacency row tile (no self loops)
    b_ref:   (1, F_out)      f32
    o_ref:   (Bt, tm, F_out) f32
    """
    tm = adj_ref.shape[1]
    f_out = hw_ref.shape[2]

    adj = adj_ref[...]
    inv = _inv_degree(adj)                                   # (Bt, tm, 1) f32
    hw_rows = _row_tile(hw_ref, tm).astype(jnp.float32)      # "+ I" self term
    num = _bmm_f32(adj, hw_ref[...]) + hw_rows               # (Bt, tm, F_out)
    o_ref[...] = (num * inv + b_ref[...].reshape(1, 1, f_out)).astype(o_ref.dtype)


def _gcn_kernel_post_w(h_ref, adj_ref, w_ref, b_ref, o_ref):
    """F_out > F_in path: aggregate first, then the (smaller-K) linear.

    h_ref:   (Bt, N, F_in)   bf16
    adj_ref: (Bt, tm, N)     bf16
    w_ref:   (F_in, F_out)   bf16
    b_ref:   (1, F_out)      f32
    o_ref:   (Bt, tm, F_out) f32
    """
    bt, tm, _ = adj_ref.shape
    f_in = h_ref.shape[2]
    f_out = w_ref.shape[1]

    adj = adj_ref[...]
    inv = _inv_degree(adj)
    h_rows = _row_tile(h_ref, tm).astype(jnp.float32)
    num = _bmm_f32(adj, h_ref[...]) + h_rows                 # (Bt, tm, F_in) f32
    # Flatten while still f32 (8-row sublane tile) and cast afterwards, then a
    # single (Bt*tm, F_in) @ (F_in, F_out) matmul to fill the MXU.
    agg = (num * inv).reshape(bt * tm, f_in).astype(jnp.bfloat16)
    out = jnp.dot(agg, w_ref[...], preferred_element_type=jnp.float32)
    out = out.reshape(bt, tm, f_out) + b_ref[...].reshape(1, 1, f_out)
    o_ref[...] = out.astype(o_ref.dtype)


# ----------------------------------------------------------------------------
# Host-side hardware queries and tiling heuristics.
# ----------------------------------------------------------------------------
def _vmem_capacity_bytes():
    try:
        return int(pltpu.get_tpu_info().vmem_capacity_bytes)
    except Exception:
        return 64 * 1024 * 1024        # conservative default (v7x per-core VMEM)


def _num_tensorcores():
    """TensorCores per chip: 2 on v7x, 1 on v5e/v6e (best effort, safe default 1)."""
    try:
        info = pltpu.get_tpu_info()
        for attr in ("num_cores", "tensor_cores_per_chip", "num_tensorcores",
                     "cores_per_chip"):
            v = getattr(info, attr, None)
            if v:
                return int(v)
    except Exception:
        pass
    try:
        if "v7" in jax.devices()[0].device_kind.lower():
            return 2
    except Exception:
        pass
    return 1


def _divisors(n):
    return [d for d in range(1, n + 1) if n % d == 0]


def _choose_tiles(B, N, f_stream, f_out, w_block_bytes, vmem_cap, ncores):
    """Pick (Bt, tm): batch elements per grid step and adjacency row tile.

    The footprint counts the double-buffered I/O blocks, the double-buffered
    weight block, AND the in-kernel temporaries (live bf16 adj tile, f32
    accumulator, bf16 agg) so the chosen tiles actually fit v7x's 64 MiB.
    """
    BF16 = 2

    def footprint(bt, tm):
        adj_blk = bt * tm * N * BF16
        feat_blk = bt * N * f_stream * BF16
        out_blk = bt * tm * f_out * 4
        dbuf = 2 * (adj_blk + feat_blk + out_blk) + 2 * w_block_bytes
        temps = adj_blk + bt * tm * max(f_stream, f_out) * 4 + bt * tm * f_stream * BF16
        return dbuf + temps

    budget = int(vmem_cap * 0.7)

    # Adjacency row tile: full N if it fits, else the largest divisor of N that
    # is a multiple of 16 (bf16 second-minor tile) and fits the budget.
    tm = N
    if footprint(1, N) > budget:
        for d in sorted(_divisors(N), reverse=True):
            if d < N and d % 16 == 0 and footprint(1, d) <= budget:
                tm = d
                break
        # TODO(synk): cdiv tiling + wrapper-side padding for prime-ish N on v7x.

    # Batch tile: largest divisor of B that fits. Only force >= ncores grid
    # steps when the chip actually has multiple TensorCores (v7x megacore).
    def pick(min_steps):
        for d in sorted(_divisors(B), reverse=True):
            if footprint(d, tm) > budget:
                continue
            if (B // d) * (N // tm) >= min_steps:
                return d
        return None

    max_steps = B * (N // tm)
    want = min(ncores, max_steps) if ncores > 1 else 1
    bt = pick(want) or pick(1) or 1

    # Keep the in-kernel leading-dim merge (bt*tm rows, f32) tile-aligned.
    if bt > 1 and tm % 8 != 0:
        bt = 1
    return bt, tm


# ----------------------------------------------------------------------------
# Public wrapper.
# ----------------------------------------------------------------------------
def gcn_layer(h, adj, weight, bias):
    """Pallas GCN layer forward.

    Args:
      h:      (B, N, F_in)  float32   node features
      adj:    (B, N, N)     float32   adjacency (self loops added internally)
      weight: (F_in, F_out) float32   (transposed vs. nn.Linear's (out, in))
      bias:   (F_out,)      float32
    Returns:
      (B, N, F_out) float32
    """
    B, N, F_in = h.shape
    assert adj.shape == (B, N, N)
    F_out = weight.shape[1]

    vmem_cap = _vmem_capacity_bytes()
    ncores = _num_tensorcores()

    # Cast the dominant HBM streams to bf16 at the boundary (halves the bytes
    # the kernel streams); degree sums are re-accumulated in f32 in-kernel.
    # TODO(synk): for 0/1 adjacency, quantize adj to int8 (v5e/v6e) / fp8 (v7x).
    adj_bf = adj.astype(jnp.bfloat16)
    bias2d = bias.reshape(1, F_out).astype(jnp.float32)

    pre_hw = F_out <= F_in
    if pre_hw:
        # out = (adj' @ (h W)) / deg + b : h @ W done once by XLA outside the
        # kernel; the streamed feature block is N*F_out (< N*F_in).
        feat = jnp.einsum("bnf,fo->bno", h, weight,
                          preferred_element_type=jnp.float32).astype(jnp.bfloat16)
        f_stream, w_block_bytes = F_out, 0
        kernel = _gcn_kernel_pre_hw
    else:
        # out = ((adj' @ h) / deg) @ W + b : scale applied on the smaller F_in side.
        feat = h.astype(jnp.bfloat16)
        f_stream, w_block_bytes = F_in, 2 * F_in * F_out
        kernel = _gcn_kernel_post_w

    bt, tm = _choose_tiles(B, N, f_stream, F_out, w_block_bytes, vmem_cap, ncores)
    grid = (B // bt, N // tm)

    in_specs = [
        pl.BlockSpec((bt, N, f_stream), lambda b, r: (b, 0, 0)),   # feat (full N)
        pl.BlockSpec((bt, tm, N), lambda b, r: (b, r, 0)),         # adj row tile
    ]
    args = [feat, adj_bf]
    if not pre_hw:
        in_specs.append(pl.BlockSpec((F_in, F_out), lambda b, r: (0, 0)))
        args.append(weight.astype(jnp.bfloat16))
    in_specs.append(pl.BlockSpec((1, F_out), lambda b, r: (0, 0)))
    args.append(bias2d)

    return pl.pallas_call(
        kernel,
        out_shape=jax.ShapeDtypeStruct((B, N, F_out), h.dtype),
        grid_spec=pltpu.PrefetchScalarGridSpec(
            num_scalar_prefetch=0,
            grid=grid,
            in_specs=in_specs,
            out_specs=pl.BlockSpec((bt, tm, F_out), lambda b, r: (b, r, 0)),
        ),
        compiler_params=pltpu.CompilerParams(
            dimension_semantics=("parallel", "parallel"),
            vmem_limit_bytes=int(vmem_cap * 3 // 4),
        ),
    )(*args)


def gcn_layer_ref(h, adj, weight, bias):
    """Pure-JAX reference matching the PyTorch forward (f32 throughout)."""
    B, N, _ = h.shape
    adjp = adj + jnp.eye(N, dtype=h.dtype)[None]
    deg = adjp.sum(-1)[..., None]
    h_agg = jnp.einsum("bij,bjf->bif", adjp, h) / deg
    return jnp.einsum("bnf,fo->bno", h_agg, weight) + bias


if __name__ == "__main__":
    def run_case(B, N, F_in, F_out):
        key = jax.random.PRNGKey(0)
        k_h, k_adj, k_w, k_b = jax.random.split(key, 4)
        h = jax.random.normal(k_h, (B, N, F_in), dtype=jnp.float32)
        adj = jax.random.uniform(k_adj, (B, N, N), dtype=jnp.float32)
        bound = 1.0 / (F_in ** 0.5)
        weight = jax.random.uniform(k_w, (F_in, F_out), dtype=jnp.float32,
                                    minval=-bound, maxval=bound)
        bias = jax.random.uniform(k_b, (F_out,), dtype=jnp.float32,
                                  minval=-bound, maxval=bound)

        out = jax.block_until_ready(gcn_layer(h, adj, weight, bias))
        ref = gcn_layer_ref(h, adj, weight, bias)
        assert out.shape == (B, N, F_out), out.shape
        # bf16 HBM streams + approx reciprocal -> small drift vs. f32 reference.
        err = jnp.max(jnp.abs(out - ref))
        assert jnp.allclose(out, ref, atol=5e-2, rtol=5e-2), f"max abs err = {err}"

    # Demo shape from the module spec: batch=2, agents=8, F_in=16 -> F_out=32
    # (post-W path: aggregate then linear).
    run_case(2, 8, 16, 32)
    # Exercises multi-batch tiling and the precomputed-hW (F_out < F_in) path.
    run_case(4, 16, 32, 16)

    print("KERNEL_OK")
</pallas_src>

<mosaic_0001>
module attributes {stable_mosaic.version = 11 : i64} {
  func.func @_gcn_kernel_post_w(%arg0: i32, %arg1: i32, %arg2: memref<2x8x16xbf16, #tpu.memory_space<vmem>>, %arg3: memref<2x8x8xbf16, #tpu.memory_space<vmem>>, %arg4: memref<16x32xbf16, #tpu.memory_space<vmem>>, %arg5: memref<1x32xf32, #tpu.memory_space<vmem>>, %arg6: memref<2x8x32xf32, #tpu.memory_space<vmem>>) attributes {dimension_semantics = [#tpu.dimension_semantics<parallel>, #tpu.dimension_semantics<parallel>], iteration_bounds = array<i64: 1, 1>, scalar_prefetch = 0 : i64, scratch_operands = 0 : i64, tpu.core_type = #tpu.core_type<tc>, window_params = [{transform_indices = @transform_0, window_bounds = array<i64: 2, 8, 16>}, {transform_indices = @transform_1, window_bounds = array<i64: 2, 8, 8>}, {pipeline_mode = #tpu.pipeline_mode<synchronous>, transform_indices = @transform_2, window_bounds = array<i64: 16, 32>}, {pipeline_mode = #tpu.pipeline_mode<synchronous>, transform_indices = @transform_3, window_bounds = array<i64: 1, 32>}, {transform_indices = @transform_4, window_bounds = array<i64: 2, 8, 32>}]} {
    %c0 = arith.constant 0 : index
    %c0_0 = arith.constant 0 : index
    %c0_1 = arith.constant 0 : index
    %0 = vector.load %arg3[%c0, %c0_0, %c0_1] : memref<2x8x8xbf16, #tpu.memory_space<vmem>>, vector<2x8x8xbf16>
    %1 = arith.extf %0 : vector<2x8x8xbf16> to vector<2x8x8xf32>
    %cst = arith.constant dense<0.000000e+00> : vector<2x8xf32>
    %2 = vector.multi_reduction <add>, %1, %cst [2] : vector<2x8x8xf32> to vector<2x8xf32>
    %3 = vector.shape_cast %2 : vector<2x8xf32> to vector<2x8x1xf32>
    %cst_2 = arith.constant 1.000000e+00 : f32
    %4 = vector.broadcast %cst_2 : f32 to vector<2x8x1xf32>
    %5 = arith.addf %3, %4 : vector<2x8x1xf32>
    %6 = tpu.reciprocal %5 {approx = true} : vector<2x8x1xf32> -> vector<2x8x1xf32>
    %c0_3 = arith.constant 0 : index
    %c0_4 = arith.constant 0 : index
    %c0_5 = arith.constant 0 : index
    %7 = vector.load %arg2[%c0_3, %c0_4, %c0_5] : memref<2x8x16xbf16, #tpu.memory_space<vmem>>, vector<2x8x16xbf16>
    %8 = arith.extf %7 : vector<2x8x16xbf16> to vector<2x8x16xf32>
    %c0_6 = arith.constant 0 : index
    %c0_7 = arith.constant 0 : index
    %c0_8 = arith.constant 0 : index
    %9 = vector.load %arg2[%c0_6, %c0_7, %c0_8] : memref<2x8x16xbf16, #tpu.memory_space<vmem>>, vector<2x8x16xbf16>
    "tpu.trace_start"() <{level = 10 : i32, message = "bmk,bkn->bmn"}> : () -> ()
    %cst_9 = arith.constant dense<0.000000e+00> : vector<2x8x16xf32>
    %10 = tpu.matmul %0, %9, %cst_9 {dimension_numbers = #tpu.dot_dimension_numbers<[2], [1], [1], [2], [0, 0, 0, 1, 1, 2], [0], [0]>} : vector<2x8x8xbf16>, vector<2x8x16xbf16>, vector<2x8x16xf32> -> vector<2x8x16xf32>
    "tpu.trace_stop"() : () -> ()
    %11 = arith.addf %10, %8 : vector<2x8x16xf32>
    %12 = vector.broadcast %6 : vector<2x8x1xf32> to vector<2x8x16xf32>
    %13 = arith.mulf %11, %12 : vector<2x8x16xf32>
    %14 = vector.shape_cast %13 : vector<2x8x16xf32> to vector<16x16xf32>
    %15 = arith.truncf %14 : vector<16x16xf32> to vector<16x16xbf16>
    %c0_10 = arith.constant 0 : index
    %c0_11 = arith.constant 0 : index
    %16 = vector.load %arg4[%c0_10, %c0_11] : memref<16x32xbf16, #tpu.memory_space<vmem>>, vector<16x32xbf16>
    %cst_12 = arith.constant dense<0.000000e+00> : vector<16x32xf32>
    %17 = tpu.matmul %15, %16, %cst_12 {dimension_numbers = #tpu.dot_dimension_numbers<[1], [0], [0], [1], [0, 0, 1, 1], [], []>} : vector<16x16xbf16>, vector<16x32xbf16>, vector<16x32xf32> -> vector<16x32xf32>
    %18 = vector.shape_cast %17 : vector<16x32xf32> to vector<2x8x32xf32>
    %c0_13 = arith.constant 0 : index
    %c0_14 = arith.constant 0 : index
    %19 = vector.load %arg5[%c0_13, %c0_14] : memref<1x32xf32, #tpu.memory_space<vmem>>, vector<1x32xf32>
    %20 = vector.shape_cast %19 : vector<1x32xf32> to vector<1x1x32xf32>
    %21 = vector.broadcast %20 : vector<1x1x32xf32> to vector<2x8x32xf32>
    %22 = arith.addf %18, %21 : vector<2x8x32xf32>
    %c0_15 = arith.constant 0 : index
    %c0_16 = arith.constant 0 : index
    %c0_17 = arith.constant 0 : index
    %23 = vector.load %arg6[%c0_15, %c0_16, %c0_17] : memref<2x8x32xf32, #tpu.memory_space<vmem>>, vector<2x8x32xf32>
    tpu.vector_store %arg6[%c0_15, %c0_16, %c0_17], %22 {strides = array<i32>} : memref<2x8x32xf32, #tpu.memory_space<vmem>>, vector<2x8x32xf32>,
    return
  }
  func.func @transform_0(%arg0: i32, %arg1: i32) -> (i32, i32, i32) {
    %c0_i32 = arith.constant 0 : i32
    %c0_i32_0 = arith.constant 0 : i32
    %c0_i32_1 = arith.constant 0 : i32
    return %arg0, %c0_i32, %c0_i32_0 : i32, i32, i32
  }
  func.func @transform_1(%arg0: i32, %arg1: i32) -> (i32, i32, i32) {
    %c0_i32 = arith.constant 0 : i32
    %c0_i32_0 = arith.constant 0 : i32
    return %arg0, %arg1, %c0_i32 : i32, i32, i32
  }
  func.func @transform_2(%arg0: i32, %arg1: i32) -> (i32, i32) {
    %c0_i32 = arith.constant 0 : i32
    %c0_i32_0 = arith.constant 0 : i32
    %c0_i32_1 = arith.constant 0 : i32
    return %c0_i32, %c0_i32_0 : i32, i32
  }
  func.func @transform_3(%arg0: i32, %arg1: i32) -> (i32, i32) {
    %c0_i32 = arith.constant 0 : i32
    %c0_i32_0 = arith.constant 0 : i32
    %c0_i32_1 = arith.constant 0 : i32
    return %c0_i32, %c0_i32_0 : i32, i32
  }
  func.func @transform_4(%arg0: i32, %arg1: i32) -> (i32, i32, i32) {
    %c0_i32 = arith.constant 0 : i32
    %c0_i32_0 = arith.constant 0 : i32
    return %arg0, %arg1, %c0_i32 : i32, i32, i32
  }
}

</mosaic_0001>

<bundles_post_ra>
// kernel: tpu_custom_call.1
= control target key start
LH: loop header
LB: loop body
LE: loop exit
PB: predicated region body
PF: predicated region fallthrough
CT: control target
= control target key end

     0   :  { %9 = vsyncpa [#allocation3], 0  ;;  %s501_s0 = inlined_call_operand.hbm [shape: bf16[2,8,16], index: 0, kind: input, shape index: {}]   ;;  %s502_s1 = inlined_call_operand.hbm [shape: bf16[2,8,8], index: 1, kind: input, shape index: {}]   ;;  %s503_s2 = inlined_call_operand.hbm [shape: bf16[16,32], index: 2, kind: input, shape index: {}]   ;;  %s504_s3 = inlined_call_operand.vmem [shape: f32[1,32], index: 3, kind: input, shape index: {}]   ;;  %s505_s4 = inlined_call_operand.hbm [shape: f32[2,8,32], index: 4, kind: output, shape index: {}]  }
   0x1   :  { %10 = vsyncpa [#allocation6], 0 }
   0x2   :  { %11 = vsyncpa [#allocation4], 0  ;;  %s396_s15 = smov [#allocation5]   ;;  %s397_s17 = smov [#allocation2]  }
   0x3   :  { %s29_s16 = sshll.u32 %s396_s15, 4  ;;  %s17_s18 = sshll.u32 %s397_s17, 4  ;;  %s30_s16 = int_to_ptr.vmem [resolvable:$true] %s29_s16  ;;  %s431_s18 = int_to_ptr.vmem [resolvable:$true] %s17_s18 }
   0x4   :  { %s302_s21 = scalar_lea.hbm %s502_s1, 128 }
   0x5   :  { %p303_p0 = scmp.ne.s32.totalorder %s502_s1, %s302_s21  ;;  %p306_p1 = scmp.lt.u32.totalorder %s302_s21, %s502_s1 }
   0x7   :  { %p308_p2 = pnand %p306_p1, %p303_p0 }
   0x9   :  { %311 = shalt.err (!%p308_p2)
}
   0xa   :  { %s312_s26 = scalar_lea.vmem %s30_s16, 128  ;;  %p317_p4 = scmp.lt.s32.totalorder %s30_s16, %s30_s16 }
   0xb   :  { %p313_p3 = scmp.ne.s32.totalorder %s30_s16, %s312_s26  ;;  %p318_p5 = scmp.lt.s32.totalorder %s312_s26, %s312_s26 }
   0xd   :  { %p319_p6 = por %p318_p5, %p317_p4 }
   0xf   :  { %p320_p7 = pnand %p319_p6, %p313_p3 }
  0x11   :  { %323 = shalt.err (!%p320_p7)
}
  0x12   :  { %s398_s27 = smov 64   ;;  %s399_s28 = smov 4  }
  0x13   :  { %35 = dma.hbm_to_vmem [thread:$0]  %s502_s1, 128, %s30_s16, [#allocation6], %s398_s27, %s398_s27, %s399_s28  }
  0x14   :  { %s324_s7 = scalar_lea.hbm %s501_s0, 128 }
  0x15   :  { %p325_p8 = scmp.ne.s32.totalorder %s501_s0, %s324_s7  ;;  %p328_p9 = scmp.lt.u32.totalorder %s324_s7, %s501_s0 }
  0x17   :  { %p330_p10 = pnand %p328_p9, %p325_p8 }
  0x19   :  { %333 = shalt.err (!%p330_p10)
}
  0x1a   :  { %s334_s12 = scalar_lea.vmem %s431_s18, 128  ;;  %p339_p12 = scmp.lt.s32.totalorder %s431_s18, %s431_s18 }
  0x1b   :  { %p335_p11 = scmp.ne.s32.totalorder %s431_s18, %s334_s12  ;;  %p340_p13 = scmp.lt.s32.totalorder %s334_s12, %s334_s12 }
  0x1d   :  { %p341_p0 = por %p340_p13, %p339_p12 }
  0x1f   :  { %p342_p1 = pnand %p341_p0, %p335_p11 }
  0x21   :  { %345 = shalt.err (!%p342_p1)
}
  0x22   :  { %23 = dma.hbm_to_vmem [thread:$0]  %s501_s0, 128, %s431_s18, [#allocation3], %s398_s27, %s398_s27, %s399_s28  }
  0x23   :  { %s400_s14 = smov [#allocation7]   ;;  %s346_s19 = scalar_lea.hbm %s503_s2, 128 }
  0x24   :  { %s41_s15 = sshll.u32 %s400_s14, 4  ;;  %p347_p2 = scmp.ne.s32.totalorder %s503_s2, %s346_s19  ;;  %s42_s15 = int_to_ptr.vmem [resolvable:$true] %s41_s15 }
  0x25   :  { %p350_p3 = scmp.lt.u32.totalorder %s346_s19, %s503_s2 }
  0x27   :  { %p352_p4 = pnand %p350_p3, %p347_p2 }
  0x29   :  { %355 = shalt.err (!%p352_p4)
}
  0x2a   :  { %s356_s24 = scalar_lea.vmem %s42_s15, 128  ;;  %p361_p6 = scmp.lt.s32.totalorder %s42_s15, %s42_s15 }
  0x2b   :  { %p357_p5 = scmp.ne.s32.totalorder %s42_s15, %s356_s24  ;;  %p362_p7 = scmp.lt.s32.totalorder %s356_s24, %s356_s24 }
  0x2d   :  { %p363_p8 = por %p362_p7, %p361_p6 }
  0x2f   :  { %p364_p9 = pnand %p363_p8, %p357_p5 }
  0x31   :  { %367 = shalt.err (!%p364_p9)
}
  0x32   :  { %47 = dma.hbm_to_vmem [thread:$0]  %s503_s2, 128, %s42_s15, [#allocation6], %s398_s27, %s398_s27, %s399_s28  }
  0x33   :  { %390 = dma.done.wait [#allocation3], 128  }
  0x34   :  { %391 = vsyncadd [#allocation3], 4294967168 }
  0x35   :  { %392 = dma.done.wait [#allocation6], 256  }
  0x36   :  { %393 = vsyncadd [#allocation6], 4294967040  ;;  %v401_v0 = vmov 0.0   ;;  %vm402_vm0 = vmmov 0   ;;  %vm82_vm1 = vcmask 1043456   ;;  %vm64_vm2 = vcmask 64512  }
  0x37   :  { %269 = vmatprep.subr.bf16.mxu0 %v401_v0  ;;  %275 = vmatprep.subr.bf16.mxu1 %v401_v0  ;;  %v75_v1 = vld [vmem:[#allocation2] sm:$0xf]  ;;  %v76_v2 = vld [vmem:[#allocation2 + $0x4] sm:$0xf]  ;;  %v60_v3 = vld [vmem:[#allocation5] sm:$0xf] }
  0x38   :  { %271 = vmatprep.mubr.msk.bf16.mxu0 %vm402_vm0, %v401_v0  ;;  %277 = vmatprep.mubr.msk.bf16.mxu1 %vm402_vm0, %v401_v0  ;;  %v84_v4 = vsel %vm82_vm1, %v75_v1, 0  ;;  %v130_v5 = vsel %vm82_vm1, %v76_v2, 0  ;;  %v61_v6 = vld [vmem:[#allocation5 + $0x4] sm:$0xf]  ;;  %v62_v7 = vunpack.c.l.bf16 %v60_v3  ;;  %v297_v11 = vld [vmem:[#allocation7] sm:$0xff]   ;;  %v77_v16 = vunpack.c.l.bf16 %v75_v1  ;;  %s403_s26 = smov [#allocation8]  }
  0x39   :  { %270 = vmatpush3.bf16.msra.mxu0 %v84_v4  ;;  %276 = vmatpush3.bf16.msra.mxu1 %v130_v5  ;;  %v63_v8 = vunpack.c.l.bf16 %v61_v6  ;;  %v78_v17 = vunpack.c.l.bf16 %v76_v2  ;;  %vm183_vm3 = vcmask 130048   ;;  %v262_v33 = vld [vmem:[%s504_s3] ss:$0 sm:$0xff]  ;;  %s245_s27 = sshll.u32 %s403_s26, 4  ;;  %vm237_vm4 = vcmask 261120   ;;  %s246_s27 = int_to_ptr.vmem [resolvable:$true] %s245_s27 }
  0x3a   :  { %v65_v9 = vsel %vm64_vm2, %v62_v7, 0.0  ;;  %281 = vmatprep.subr.bf16.mxu0 %v401_v0  ;;  %s368_s28 = scalar_lea.vmem %s246_s27, 256  ;;  %p373_p11 = scmp.lt.s32.totalorder %s246_s27, %s246_s27 }
  0x3b   :  { %66 = vadd.xlane.f32.xlu0 %v65_v9  ;;  %v68_v10 = vsel %vm64_vm2, %v63_v8, 0.0  ;;  %p369_p10 = scmp.ne.s32.totalorder %s246_s27, %s368_s28  ;;  %p374_p12 = scmp.lt.s32.totalorder %s368_s28, %s368_s28 }
  0x3c   :  { %272 = vmatmul.mubr.msk.bf16.vlgmr.msra.gmra.mrb[0].mxu0 %vm64_vm2, %v60_v3  ;;  %278 = vmatmul.mubr.msk.bf16.vlgmr.msra.gmra.mrb[0].mxu1 %vm64_vm2, %v61_v6 }
  0x3d   :  { %283 = vmatprep.mubr.msk.bf16.mxu0 %vm402_vm0, %v401_v0  ;;  %282 = vmatpush3.bf16.msra.mxu0 %v297_v11  ;;  %p375_p13 = por %p374_p12, %p373_p11 }
  0x3f   :  { %69 = vadd.xlane.f32.xlu0 %v68_v10  ;;  %p376_p0 = pnand %p375_p13, %p369_p10 }
  0xc8   :  { %v67_v12 = vpop.xlane.xlu0 %66 }
  0xc9   :  { %v71_v15 = vadd.f32 1.0, %v67_v12 }
  0xcc   :  { %v70_v13 = vpop.xlane.xlu0 %69 }
  0xcd   :  { %v72_v14 = vadd.f32 1.0, %v70_v13 }
  0xcf   :  { %298 = vrcp.f32 %v72_v14 }
  0xd0   :  { %300 = vrcp.f32 %v71_v15 }
  0xd9   :  { %v299_v18 = vpop.eup %298 }
  0xda   :  { %v301_v25 = vpop.eup %300 }
 0x10f   :  { %v120_v19 = vpop.f32.mrb[0].mxu0  ;;  %v166_v20 = vpop.f32.mrb[0].mxu1 }
 0x110   :  { %v121_v21 = vadd.f32 %v120_v19, %v77_v16  ;;  %v167_v22 = vadd.f32 %v166_v20, %v78_v17  ;;  %v273_v23 = vpop.f32.mrb[1].mxu0  ;;  %v279_v24 = vpop.f32.mrb[1].mxu1 }
 0x111   :  { %v123_v26 = vpop.f32.mrb[2].mxu0  ;;  %v169_v27 = vpop.f32.mrb[2].mxu1 }
 0x112   :  { %v172_v28 = vmul.f32 %v301_v25, %v121_v21  ;;  %v173_v29 = vmul.f32 %v299_v18, %v167_v22  ;;  %v274_v30 = vpop.f32.mrb[3].mxu0  ;;  %v280_v31 = vpop.f32.mrb[3].mxu1 }
 0x114   :  { %v174_v32 = vpack.c.bf16 %v173_v29, %v172_v28 }
 0x116   :  { %284 = vmatmul.mubr.msk.bf16.vlgmr.msra.gmra.mrb[4].mxu0 %vm183_vm3, %v174_v32 }
 0x1e9   :  { %v221_v34 = vpop.f32.mrb[4].mxu0 }
 0x1ea   :  { %v235_v35 = vadd.f32 %v262_v33, %v221_v34  ;;  %v285_v36 = vpop.f32.mrb[5].mxu0 }
 0x1eb   :  { %v224_v37 = vpop.f32.mrb[6].mxu0 }
 0x1ec   :  { %238 = vst.msk [vmem:[#allocation8] sm:$0xff] %vm237_vm4, %v235_v35  ;;  %v236_v38 = vadd.f32 %v262_v33, %v224_v37  ;;  %v286_v39 = vpop.f32.mrb[7].mxu0 }
 0x1ee   :  { %239 = vst.msk [vmem:[#allocation8 + $0x8] sm:$0xff] %vm237_vm4, %v236_v38 }
 0x1ef   :  { %379 = shalt.err (!%p376_p0)
}
 0x1f0   :  { %s380_s30 = scalar_lea.hbm %s505_s4, 256 }
 0x1f1   :  { %p381_p1 = scmp.ne.s32.totalorder %s505_s4, %s380_s30  ;;  %p384_p2 = scmp.lt.u32.totalorder %s380_s30, %s505_s4 }
 0x1f3   :  { %p386_p3 = pnand %p384_p2, %p381_p1 }
 0x1f5   :  { %389 = shalt.err (!%p386_p3)
}
 0x1f6   :  { %s404_s9 = smov 128   ;;  %s405_s10 = smov 8  }
 0x1f7   :  { %251 = dma.vmem_to_hbm [thread:$0]  %s246_s27, 256, %s505_s4, [#allocation4], %s404_s9, %s404_s9, %s405_s10  }
 0x1f8   :  { %394 = dma.done.wait [#allocation4], 256  }
 0x1f9   :  { %395 = vsyncadd [#allocation4], 4294967040 }
 0x1fa   :  { %255 = vsyncpa [#allocation3], 1 }
 0x1fb   :  { %256 = vsyncpa [#allocation6], 1 }
 0x1fc   :  { %257 = vsyncpa [#allocation4], 1 }

</bundles_post_ra>
